<compile_context>
chip_gen: v6e
topology: v6e:2x2x1
jax: 0.10.0
libtpu: 0.0.40
codegen_flags: <defaults>
</compile_context>

<pallas_src>
import functools
import math

import jax
import jax.numpy as jnp
from jax.experimental import pallas as pl
from jax.experimental.pallas import tpu as pltpu


def layernorm_kernel(x_ref, ab_ref, o_ref, *, hidden_size, padded_hidden,
                     one_pass, bf16_epilogue):
    # x_ref: (ROW_TILE, Hp); ab_ref: (2, Hp) = stacked [a_2; b_2] (zero-padded).
    x = x_ref[...].astype(jnp.float32)

    inv_n = jnp.float32(1.0 / hidden_size)
    # torch.std uses Bessel's correction (divide by N-1); hidden_size == 1
    # yields NaN, matching torch.std's degenerate case.
    inv_nm1 = (jnp.float32(1.0 / (hidden_size - 1)) if hidden_size > 1
               else jnp.float32(float("inf")))

    s1 = jnp.sum(x, axis=-1, keepdims=True)
    mean = s1 * inv_n
    # Padded lanes hold -mean here; a_2/b_2 are zero there and the pad is
    # sliced off in the wrapper, so they never leak into real outputs.
    diff = x - mean

    if one_pass:
        # Single reduction pass (E[x^2] - mean^2): padded lanes are zero so no
        # lane mask is needed and no masked full-tile temp has to stay live.
        s2 = jnp.sum(x * x, axis=-1, keepdims=True)
        var = jnp.maximum(s2 - mean * s1, 0.0) * inv_nm1
    else:
        # Two-pass form (numerically stable) for f32 outputs.
        if padded_hidden != hidden_size:
            lane = jax.lax.broadcasted_iota(jnp.int32, (1, padded_hidden), 1)
            dsq = jnp.where(lane < hidden_size, diff, 0.0)
        else:
            dsq = diff
        var = jnp.sum(dsq * dsq, axis=-1, keepdims=True) * inv_nm1

    std = jnp.sqrt(var)
    # eps is added to std (not variance), matching the PyTorch module.
    denom = std + jnp.float32(1e-6)
    # EUP approximate reciprocal (frees a VALU slot, shortens the dep chain)
    # plus one Newton step to recover ~f32 accuracy on the (ROW_TILE, 1) values.
    inv = pl.reciprocal(denom, approx=True)
    inv = inv * (jnp.float32(2.0) - denom * inv)

    if bf16_epilogue:
        # Packed bf16 epilogue (2 elems/lane) for bf16 outputs; halves the
        # VALU work of the scale/shift on v6e/v7x.  (v5e has no bf16 VALU but
        # the emulated path stays correct.)
        a = ab_ref[0:1, :].astype(jnp.bfloat16)
        b = ab_ref[1:2, :].astype(jnp.bfloat16)
        norm = (diff * inv).astype(jnp.bfloat16)
        o_ref[...] = (a * norm + b).astype(o_ref.dtype)
    else:
        a = ab_ref[0:1, :].astype(jnp.float32)
        b = ab_ref[1:2, :].astype(jnp.float32)
        o_ref[...] = (a * diff * inv + b).astype(o_ref.dtype)


def _vmem_budget_bytes():
    """Generation-aware VMEM sizing (v7x: 64 MiB/TC; v5e/v6e: 128 MiB)."""
    try:
        cap = int(pltpu.get_tpu_info().vmem_capacity_bytes)
    except Exception:
        cap = 64 * 1024 * 1024  # assume the smallest (v7x) if the query fails
    vmem_limit = (3 * cap) // 4            # 48 MiB on v7x, 96 MiB on v5e/v6e
    data_budget = vmem_limit - (2 << 20)   # headroom for the (2, Hp) params etc.
    return data_budget, vmem_limit


def _choose_row_tile(rows, padded_hidden, itemsize, sublane, *,
                     target_rows, data_budget_bytes):
    """Largest sublane-multiple row tile that fits the per-step VMEM budget."""
    # Per input row and per grid step:
    #   double-buffered input block + double-buffered output block
    #   + ~2 full-tile f32 intermediates (the upcast x and diff/x*x).
    bytes_per_row = 2 * 2 * padded_hidden * itemsize + 2 * padded_hidden * 4
    budget_rows = max(sublane, data_budget_bytes // max(bytes_per_row, 1))
    rows_rounded = -(-rows // sublane) * sublane  # ceil to sublane multiple
    tile = min(target_rows, budget_rows, rows_rounded)
    return max(sublane, (tile // sublane) * sublane)


def layer_norm(x, a_2, b_2, *, row_tile=None):
    """LayerNorm over the last axis of x (PyTorch torch.std semantics)."""
    orig_shape = x.shape
    hidden = orig_shape[-1]
    rows = math.prod(orig_shape[:-1]) if len(orig_shape) > 1 else 1
    x2d = x.reshape(rows, hidden)

    # Fuse scale/shift into a single (2, hidden) operand: one DMA stream, one
    # BlockSpec, one sublane-padded slab instead of two.
    ab = jnp.stack([a_2.reshape(hidden), b_2.reshape(hidden)], axis=0)

    # Pad hidden up to a lane multiple so the output BlockSpec is lane-dense
    # (unmasked vst) even for small/odd hidden sizes; padded a/b lanes are zero
    # and the pad is sliced off below.  No-op for typical LLM widths.
    pad = (-hidden) % 128
    hidden_p = hidden + pad
    if pad:
        x2d = jnp.pad(x2d, ((0, 0), (0, pad)))
        ab = jnp.pad(ab, ((0, 0), (0, pad)))

    itemsize = jnp.dtype(x.dtype).itemsize
    sublane = 16 if itemsize == 2 else 8  # full packed vregs for bf16/f16

    data_budget, vmem_limit = _vmem_budget_bytes()
    if row_tile is None:
        # Let the (intermediate-aware) VMEM budget be binding; target_rows=2048
        # keeps per-step blocks >= ~8 MiB for hidden=1024 f32, amortizing the
        # ~0.35us/step overhead even at v7x's 3.2 TB/s HBM.
        row_tile = _choose_row_tile(rows, hidden_p, itemsize, sublane,
                                    target_rows=2048,
                                    data_budget_bytes=data_budget)
        # Keep the row grid at >= ~4 steps so the "parallel" axis can actually
        # be sharded across v7x's two TensorCores; harmless on v5e/v6e.
        quarter = -(-rows // 4)
        quarter = -(-quarter // sublane) * sublane
        row_tile = max(sublane, min(row_tile, quarter))

    one_pass = itemsize < 4              # bf16/f16: one reduction pass suffices
    bf16_epilogue = x.dtype == jnp.bfloat16

    grid = (pl.cdiv(rows, row_tile),)
    kernel = functools.partial(
        layernorm_kernel, hidden_size=hidden, padded_hidden=hidden_p,
        one_pass=one_pass, bf16_epilogue=bf16_epilogue)

    out = pl.pallas_call(
        kernel,
        out_shape=jax.ShapeDtypeStruct((rows, hidden_p), x.dtype),
        grid_spec=pltpu.PrefetchScalarGridSpec(
            num_scalar_prefetch=0,
            grid=grid,
            in_specs=[
                pl.BlockSpec((row_tile, hidden_p), lambda i: (i, 0)),
                pl.BlockSpec((2, hidden_p), lambda i: (0, 0)),
            ],
            out_specs=pl.BlockSpec((row_tile, hidden_p), lambda i: (i, 0)),
        ),
        compiler_params=pltpu.CompilerParams(
            # Row grid axis is embarrassingly parallel -> megacore sharding.
            dimension_semantics=("parallel",),
            vmem_limit_bytes=vmem_limit,
        ),
    )(x2d, ab)

    if pad:
        out = out[:, :hidden]
    return out.reshape(orig_shape)


if __name__ == "__main__":
    batch, seq, hidden = 2, 8, 32

    key = jax.random.PRNGKey(0)
    x = jax.random.normal(key, (batch, seq, hidden), dtype=jnp.float32)

    # Deterministic parameter init matching the module's __init__:
    # a_2 = ones(hidden), b_2 = zeros(hidden)
    a_2 = jnp.ones((hidden,), dtype=jnp.float32)
    b_2 = jnp.zeros((hidden,), dtype=jnp.float32)

    out = layer_norm(x, a_2, b_2)
    out = jax.block_until_ready(out)

    # Pure-JAX reference (torch.std -> ddof=1, eps added to std).
    mean = jnp.mean(x, axis=-1, keepdims=True)
    std = jnp.std(x, axis=-1, keepdims=True, ddof=1)
    ref = a_2 * (x - mean) / (std + 1e-6) + b_2

    assert out.shape == x.shape
    assert jnp.allclose(out, ref, atol=1e-5, rtol=1e-5), "mismatch vs reference"

    print("KERNEL_OK")
</pallas_src>

<mosaic_0001>
module attributes {stable_mosaic.version = 11 : i64} {
  func.func @layernorm_kernel(%arg0: i32, %arg1: memref<8x128xf32, #tpu.memory_space<vmem>>, %arg2: memref<2x128xf32, #tpu.memory_space<vmem>>, %arg3: memref<8x128xf32, #tpu.memory_space<vmem>>) attributes {dimension_semantics = [#tpu.dimension_semantics<parallel>], iteration_bounds = array<i64: 2>, scalar_prefetch = 0 : i64, scratch_operands = 0 : i64, tpu.core_type = #tpu.core_type<tc>, window_params = [{transform_indices = @transform_0, window_bounds = array<i64: 8, 128>}, {pipeline_mode = #tpu.pipeline_mode<synchronous>, transform_indices = @transform_1, window_bounds = array<i64: 2, 128>}, {transform_indices = @transform_2, window_bounds = array<i64: 8, 128>}]} {
    %c0 = arith.constant 0 : index
    %c0_0 = arith.constant 0 : index
    %0 = vector.load %arg1[%c0, %c0_0] : memref<8x128xf32, #tpu.memory_space<vmem>>, vector<8x128xf32>
    %cst = arith.constant dense<0.000000e+00> : vector<8xf32>
    %1 = vector.multi_reduction <add>, %0, %cst [1] : vector<8x128xf32> to vector<8xf32>
    %2 = vector.shape_cast %1 : vector<8xf32> to vector<8x1xf32>
    %cst_1 = arith.constant 3.125000e-02 : f32
    %3 = vector.broadcast %cst_1 : f32 to vector<8x1xf32>
    %4 = arith.mulf %2, %3 : vector<8x1xf32>
    %5 = vector.broadcast %4 : vector<8x1xf32> to vector<8x128xf32>
    %6 = arith.subf %0, %5 : vector<8x128xf32>
    %7 = tpu.iota {dimensions = array<i32: 1>} : vector<1x128xi32>
    %c32_i32 = arith.constant 32 : i32
    %8 = vector.broadcast %c32_i32 : i32 to vector<1x128xi32>
    %9 = arith.cmpi slt, %7, %8 : vector<1x128xi32>
    %cst_2 = arith.constant 0.000000e+00 : f32
    %10 = vector.shape_cast %9 : vector<1x128xi1> to vector<1x128xi1>
    %11 = vector.broadcast %10 : vector<1x128xi1> to vector<8x128xi1>
    %12 = vector.broadcast %cst_2 : f32 to vector<8x128xf32>
    %13 = arith.select %11, %6, %12 : vector<8x128xi1>, vector<8x128xf32>
    %14 = arith.mulf %13, %13 : vector<8x128xf32>
    %cst_3 = arith.constant dense<0.000000e+00> : vector<8xf32>
    %15 = vector.multi_reduction <add>, %14, %cst_3 [1] : vector<8x128xf32> to vector<8xf32>
    %16 = vector.shape_cast %15 : vector<8xf32> to vector<8x1xf32>
    %cst_4 = arith.constant 0.0322580636 : f32
    %17 = vector.broadcast %cst_4 : f32 to vector<8x1xf32>
    %18 = arith.mulf %16, %17 : vector<8x1xf32>
    %19 = math.sqrt %18 : vector<8x1xf32>
    %cst_5 = arith.constant 9.99999997E-7 : f32
    %20 = vector.broadcast %cst_5 : f32 to vector<8x1xf32>
    %21 = arith.addf %19, %20 : vector<8x1xf32>
    %22 = tpu.reciprocal %21 {approx = true} : vector<8x1xf32> -> vector<8x1xf32>
    %23 = arith.mulf %21, %22 : vector<8x1xf32>
    %cst_6 = arith.constant 2.000000e+00 : f32
    %24 = vector.broadcast %cst_6 : f32 to vector<8x1xf32>
    %25 = arith.subf %24, %23 : vector<8x1xf32>
    %26 = arith.mulf %22, %25 : vector<8x1xf32>
    %c0_7 = arith.constant 0 : index
    %c0_8 = arith.constant 0 : index
    %27 = vector.load %arg2[%c0_7, %c0_8] : memref<2x128xf32, #tpu.memory_space<vmem>>, vector<1x128xf32>
    %c1 = arith.constant 1 : index
    %c0_9 = arith.constant 0 : index
    %28 = vector.load %arg2[%c1, %c0_9] : memref<2x128xf32, #tpu.memory_space<vmem>>, vector<1x128xf32>
    %29 = vector.broadcast %27 : vector<1x128xf32> to vector<8x128xf32>
    %30 = arith.mulf %29, %6 : vector<8x128xf32>
    %31 = vector.broadcast %26 : vector<8x1xf32> to vector<8x128xf32>
    %32 = arith.mulf %30, %31 : vector<8x128xf32>
    %33 = vector.broadcast %28 : vector<1x128xf32> to vector<8x128xf32>
    %34 = arith.addf %32, %33 : vector<8x128xf32>
    %c0_10 = arith.constant 0 : index
    %c0_11 = arith.constant 0 : index
    %35 = vector.load %arg3[%c0_10, %c0_11] : memref<8x128xf32, #tpu.memory_space<vmem>>, vector<8x128xf32>
    tpu.vector_store %arg3[%c0_10, %c0_11], %34 {strides = array<i32>} : memref<8x128xf32, #tpu.memory_space<vmem>>, vector<8x128xf32>,
    return
  }
  func.func @transform_0(%arg0: i32) -> (i32, i32) {
    %c0_i32 = arith.constant 0 : i32
    %c0_i32_0 = arith.constant 0 : i32
    return %arg0, %c0_i32 : i32, i32
  }
  func.func @transform_1(%arg0: i32) -> (i32, i32) {
    %c0_i32 = arith.constant 0 : i32
    %c0_i32_0 = arith.constant 0 : i32
    %c0_i32_1 = arith.constant 0 : i32
    return %c0_i32, %c0_i32_0 : i32, i32
  }
  func.func @transform_2(%arg0: i32) -> (i32, i32) {
    %c0_i32 = arith.constant 0 : i32
    %c0_i32_0 = arith.constant 0 : i32
    return %arg0, %c0_i32 : i32, i32
  }
}

</mosaic_0001>

<bundles_post_ra>
// kernel: tpu_custom_call.1
= control target key start
LH: loop header
LB: loop body
LE: loop exit
PB: predicated region body
PF: predicated region fallthrough
CT: control target
= control target key end

     0   :  { %7 = vsyncpa [#allocation3], 0  ;;  %s696_s0 = inlined_call_operand.hbm [shape: f32[16,128], index: 0, kind: input, shape index: {}]   ;;  %s697_s1 = inlined_call_operand.hbm [shape: f32[2,128], index: 1, kind: input, shape index: {}]   ;;  %s698_s2 = inlined_call_operand.hbm [shape: f32[16,128], index: 2, kind: output, shape index: {}]  }
   0x1   :  { %9 = vsyncpa [#allocation3 + $0x1], 0 }
   0x2   :  { %10 = vsyncpa [#allocation6], 0 }
   0x3   :  { %11 = vsyncpa [#allocation4], 0 }
   0x4   :  { %13 = vsyncpa [#allocation4 + $0x1], 0  ;;  %s526_s9 = smov 0   ;;  %s528_s10 = smov 0  }
   0x5   :  { %s530_s11 = smov 0   ;;  %s532_s12 = smov 0  }
   0x6 LB: > { %s547_s13 = sadd.s32 4294967295, %s506_s12   ;;  %s307_s14 = sadd.s32 4294967294, %s506_s12   ;;  %s506_s12 = sphi %s532_s12, %s721_s12   ;;  %s502_s11 = sphi %s530_s11, %s720_s11   ;;  %s498_s10 = sphi %s528_s10, %s719_s10   ;;  %s494_s9 = sphi %s526_s9, %s718_s9  }
   0x7   : > { %p39_p0 = scmp.ne.s32.totalorder %s498_s10, %s494_s9  ;;  %p699_p1 = scmp.eq.s32.totalorder %s547_s13, 0 }
   0x8   : > { %p90_p3 = scmp.eq.s32.totalorder %s307_s14, 1  ;;  %p308_p5 = scmp.ge.s32.totalorder %s506_s12, 1 }
   0x9   : > { %p556_p4 = por %p699_p1, %p39_p0  ;;  %p97_p7 = scmp.lt.s32.totalorder %s506_s12, 3 }
   0xa   : > { %p561_p6 = por %p90_p3, %p39_p0  ;;  %s508_s18 = smov [#allocation5]  }
   0xb   : > { %s703_s15 = scalar_select %p556_p4, 1, 0 }
   0xc   : > { %s704_s16 = scalar_select %p561_p6, 1, 0 }
   0xd   : > { %p566_p8 = pnand %p308_p5, %p97_p7  ;;  %s110_s19 = sshll.u32 %s508_s18, 4  ;;  %s111_s19 = int_to_ptr.vmem [resolvable:$true] %s110_s19 }
   0xe   : > { %s574_s20 = sadd.s32 1, %s506_s12   ;;  %s26_s24 = sadd.s32 1, %s502_s11 }
   0xf   : > { %s705_s17 = scalar_select %p566_p8, 1, 0 }
  0x10   : > { %p331_p10 = pneg %p566_p8  ;;  %s23_s22 = ssub.s32 %s506_s12, %s574_s20 }
  0x11   : > { %p584_p12 = scmp.eq.s32.totalorder %s23_s22, 0  ;;  %p33_p13 = scmp.ne.s32.totalorder %s502_s11, %s498_s10 }
  0x12   : > { %p578_p11 = pnand %p331_p10, %p699_p1  ;;  %s395_s25 = scalar_lea.vmem %s111_s19, 32 }
  0x13   : > { %p396_p3 = scmp.ne.s32.totalorder %s111_s19, %s395_s25  ;;  %p403_p9 = scmp.lt.s32.totalorder %s111_s19, %s111_s19 }
  0x14   : > { %p386_p0 = pneg %p578_p11  ;;  %p404_p2 = scmp.lt.s32.totalorder %s395_s25, %s395_s25 }
  0x16   : > { %p398_p5 = pnand %p396_p3, %p386_p0  ;;  %p405_p10 = por %p404_p2, %p403_p9 }
  0x18   : > { %p399_p7 = pneg %p398_p5 }
  0x1a   : > { %p406_p1 = pnand %p405_p10, %p399_p7 }
  0x1c   : > { %409 = shalt.err (!%p406_p1)
}
  0x1d   : > { %334 = dma.hbm_to_vmem [thread:$0]  (!%p578_p11), %s697_s1, 32, %s111_s19, [#allocation6]  }
  0x1e   : > { %s601_s28 = scalar_select %p584_p12, %s502_s11, %s26_s24  }
  0x1f   : > { %p34_p1 = scmp.eq.s32.totalorder %s506_s12, 0  ;;  %p708_p2 = scmp.eq.s32.totalorder %s547_s13, 1 }
  0x20   : > { %p344_p0 = scmp.lt.s32.totalorder %s506_s12, 2  ;;  %s121_s30 = sand.u32 1, %s502_s11  }
  0x21   : > { %p609_p9 = por %p708_p2, %p33_p13  ;;  %p35_p3 = por %p34_p1, %p33_p13 }
  0x22   : > { %s311_s3 = sshll.u32 %s121_s30, 3  ;;  %s312_s4 = sshll.u32 %s506_s12, 7 }
  0x23   : > { %s709_s29 = scalar_select %p609_p9, 1, 0 }
  0x24   : > { %s622_s7 = scalar_lea.hbm %s696_s0, %s312_s4  ;;  %s125_s8 = scalar_lea.vmem [#allocation2], %s311_s3 }
  0x25   : > { %s132_s14 = sshll.u32 %s125_s8, 4  ;;  %p624_p11 = pnand %p344_p0, %p35_p3  ;;  %s133_s14 = int_to_ptr.vmem [resolvable:$true] %s132_s14 }
  0x26   : > { %s122_s19 = scalar_lea.sflag [#allocation3], %s121_s30  ;;  %s410_s21 = scalar_lea.hbm %s622_s7, 128 }
  0x27   : > { %p411_p12 = scmp.ne.s32.totalorder %s622_s7, %s410_s21  ;;  %p412_p13 = pneg %p624_p11 }
  0x28   : > { %s415_s24 = scalar_lea.hbm %s696_s0, 256  ;;  %p416_p10 = scmp.lt.s32.totalorder %s622_s7, %s696_s0 }
  0x29   : > { %p413_p5 = pnand %p412_p13, %p411_p12  ;;  %p417_p1 = scmp.lt.s32.totalorder %s415_s24, %s410_s21 }
  0x2b   : > { %p414_p7 = pneg %p413_p5  ;;  %p418_p2 = por %p417_p1, %p416_p10 }
  0x2d   : > { %p419_p0 = pnand %p418_p2, %p414_p7 }
  0x2f   : > { %422 = shalt.err (!%p419_p0)
}
  0x30   : > { %s423_s27 = scalar_lea.vmem %s133_s14, 128  ;;  %s509_s30 = smov [#allocation2]  }
  0x31   : > { %p424_p3 = scmp.ne.s32.totalorder %s133_s14, %s423_s27  ;;  %s428_s3 = sshll.u32 %s509_s30, 4  ;;  %s429_s3 = int_to_ptr.vmem [resolvable:$false] %s428_s3 }
  0x32   : > { %s430_s4 = scalar_lea.vmem %s429_s3, 256  ;;  %p431_p12 = scmp.lt.s32.totalorder %s133_s14, %s429_s3 }
  0x33   : > { %p426_p6 = pnand %p424_p3, %p412_p13  ;;  %p432_p5 = scmp.lt.s32.totalorder %s430_s4, %s423_s27 }
  0x35   : > { %p427_p9 = pneg %p426_p6  ;;  %p433_p4 = por %p432_p5, %p431_p12 }
  0x37   : > { %p434_p8 = pnand %p433_p4, %p427_p9 }
  0x39   : > { %437 = shalt.err (!%p434_p8)
}
  0x3a   : > { %338 = dma.hbm_to_vmem [thread:$0]  (!%p624_p11), %s622_s7, 128, %s133_s14, %s122_s19  }
  0x3b   : > { %p711_p7 = scmp.ne.s32.totalorder %s705_s17, 0 }
  0x3c   : > { %s645_s5 = sand.u32 (!%p711_p7), 1, %s498_s10   ;;  %p712_p4 = scmp.ne.s32.totalorder (!%p711_p7), %s703_s15, 0 }
  0x3d   : > { %141 = sbr.rel (%p711_p7) target bundleno = 413 (0x19d), region = 28  ;;  %s314_s6 = sshll.u32 (!%p711_p7), %s645_s5, 3 }
  0x3e   : > { %s144_s8 = scalar_lea.sflag (!%p711_p7), [#allocation3], %s645_s5  ;;  %s147_s21 = scalar_lea.vmem (!%p711_p7), [#allocation2], %s314_s6 }
  0x42   : > { %481 = dma.done.wait (%p712_p4), %s144_s8, 128  }
  0x43   : > { %483 = vsyncadd (%p712_p4), %s144_s8, 4294967168  ;;  %p713_p6 = scmp.eq.s32.totalorder %s547_s13, 0 }
  0x45   : > { %485 = dma.done.wait (%p713_p6), [#allocation6], 32   ;;  %p714_p8 = pmov %p713_p6 }
  0x46   : > { %v172_v0 = vld [vmem:[%s147_s21] sm:$0xff]  ;;  %v177_v1 = vlaneseq  ;;  %v317_v18 = vld [vmem:[#allocation5] ss:$0 sm:$0xff]  ;;  %v318_v22 = vld [vmem:[#allocation5 + $0x1] ss:$0 sm:$0xff]  ;;  %s320_s15 = sshll.u32 %s547_s13, 7 }
  0x47   : > { %487 = vsyncadd (%p714_p8), [#allocation6], 4294967264  ;;  %173 = vadd.xlane.f32.xlu0 %v172_v0  ;;  %s171_s17 = scalar_lea.vmem [#allocation7], %s314_s6  ;;  %s225_s19 = scalar_lea.hbm %s698_s2, %s320_s15 }
  0x48   : > { %v178_v2 = vand.u32 127, %v177_v1  ;;  %s227_s7 = sshll.u32 %s171_s17, 4  ;;  %s214_s22 = scalar_lea.sflag [#allocation4], %s645_s5  ;;  %s228_s7 = int_to_ptr.vmem [resolvable:$true] %s227_s7 }
  0x49   : > { %s438_s23 = scalar_lea.vmem %s228_s7, 128  ;;  %p715_p11 = scmp.ne.s32.totalorder %s709_s29, 0 }
  0x4a   : > { %vm179_vm0 = vcmp.lt.s32.totalorder %v178_v2, 32  ;;  %p439_p9 = scmp.ne.s32.totalorder %s228_s7, %s438_s23  ;;  %s510_s24 = smov [#allocation7]  }
  0x4b   : > { %s442_s25 = sshll.u32 %s510_s24, 4  ;;  %s443_s25 = int_to_ptr.vmem [resolvable:$false] %s442_s25 }
  0x4c   : > { %p440_p13 = pnand %p439_p9, %p715_p11  ;;  %s444_s13 = scalar_lea.vmem %s443_s25, 256 }
  0x4d   : > { %p445_p1 = scmp.lt.s32.totalorder %s228_s7, %s443_s25  ;;  %p446_p2 = scmp.lt.s32.totalorder %s444_s13, %s438_s23 }
  0x4e   : > { %p441_p10 = pneg %p440_p13 }
  0x4f   : > { %p447_p0 = por %p446_p2, %p445_p1 }
  0x51   : > { %p448_p3 = pnand %p447_p0, %p441_p10 }
  0xd0   : > { %v174_v3 = vpop.xlane.xlu0 %173 }
  0xd1   : > { %v175_v4 = vmul.f32 0.03125, %v174_v3 }
  0xd3   : > { %v176_v5 = vsub.f32 %v172_v0, %v175_v4 }
  0xd5   : > { %v182_v6 = vsel %vm179_vm0, %v176_v5, 0.0  ;;  %v205_v20 = vmul.f32 %v317_v18, %v176_v5 }
  0xd6   : > { %v183_v7 = vmul.f32 %v182_v6, %v182_v6 }
  0xd8   : > { %184 = vadd.xlane.f32.xlu0 %v183_v7 }
 0x161   : > { %v185_v8 = vpop.xlane.xlu0 %184 }
 0x162   : > { %v186_v9 = vmul.f32 0.032258064, %v185_v8 }
 0x164   : > { %380 = vrsqrt.f32 %v186_v9  ;;  %vm189_vm1 = vcmp.eq.f32.partialorder %v186_v9, inf  ;;  %v192_v12 = vand.u32 2147483648, %v186_v9  ;;  %vm191_vm2 = vcmp.eq.f32.partialorder %v186_v9, 0.0 }
 0x171   : > { %v381_v10 = vpop.eup %380 }
 0x172   : > { %v188_v11 = vmul.f32 %v381_v10, %v186_v9 }
 0x174   : > { %v190_v13 = vsel %vm189_vm1, %v186_v9, %v188_v11 }
 0x175   : > { %v193_v14 = vsel %vm191_vm2, %v192_v12, %v190_v13 }
 0x176   : > { %v194_v15 = vadd.f32 1e-06, %v193_v14 }
 0x178   : > { %382 = vrcp.f32 %v194_v15 }
 0x185   : > { %v383_v16 = vpop.eup %382 }
 0x186   : > { %v196_v17 = vmul.f32 %v383_v16, %v194_v15 }
 0x188   : > { %v197_v19 = vsub.f32 2.0, %v196_v17 }
 0x18a   : > { %v198_v21 = vmul.f32 %v383_v16, %v197_v19 }
 0x18c   : > { %v206_v23 = vmul.f32 %v205_v20, %v198_v21 }
 0x18e   : > { %v211_v24 = vadd.f32 %v318_v22, %v206_v23 }
 0x190   : > { %212 = vst [vmem:[%s171_s17] sm:$0xff] %v211_v24 }
 0x191   : > { %451 = shalt.err (!%p448_p3)
}
 0x192   : > { %s452_s26 = scalar_lea.hbm %s225_s19, 128  ;;  %s456_s3 = scalar_lea.hbm %s698_s2, 256 }
 0x193   : > { %p453_p12 = scmp.ne.s32.totalorder %s225_s19, %s452_s26  ;;  %p457_p4 = scmp.lt.s32.totalorder %s225_s19, %s698_s2 }
 0x194   : > { %p458_p6 = scmp.lt.s32.totalorder %s456_s3, %s452_s26 }
 0x195   : > { %p454_p5 = pnand %p453_p12, %p715_p11 }
 0x196   : > { %p459_p8 = por %p458_p6, %p457_p4 }
 0x197   : > { %p455_p7 = pneg %p454_p5 }
 0x199   : > { %p460_p9 = pnand %p459_p8, %p455_p7 }
 0x19b   : > { %463 = shalt.err (!%p460_p9)
}
 0x19c   : > { %329 = dma.vmem_to_hbm [thread:$0]  (%p715_p11), %s228_s7, 128, %s225_s19, %s214_s22  }
 0x19d PF: > { %s239_s6 = sand.u32 1, %s494_s9   ;;  %p716_p13 = scmp.ne.s32.totalorder %s704_s16, 0 }
 0x19e   : > { %p717_p10 = scmp.ge.s32.totalorder %s506_s12, 2  ;;  %s240_s8 = scalar_lea.sflag [#allocation4], %s239_s6 }
 0x1a0   : > { %p340_p1 = pnand %p717_p10, %p716_p13 }
 0x1a2   : > { %p341_p2 = pneg %p340_p1 }
 0x1a4   : > { %489 = dma.done.wait (%p341_p2), %s240_s8, 128  }
 0x1a5   : > { %491 = vsyncadd (%p341_p2), %s240_s8, 4294967168  ;;  %p16_p0 = scmp.ge.s32.totalorder %s574_s20, 4   ;;  %s718_s9 = smov %s498_s10 }
 0x1a6   : > { %s719_s10 = smov %s502_s11  ;;  %s720_s11 = smov %s601_s28 }
 0x1a7   : > { %s721_s12 = smov %s574_s20  ;;  %18 = sbr.rel (!%p16_p0) target bundleno = 6 (0x6), region = 77 }
 0x1ac   :  { %245 = vsyncpa [#allocation3], 1 }
 0x1ad   :  { %247 = vsyncpa [#allocation3 + $0x1], 1 }
 0x1ae   :  { %248 = vsyncpa [#allocation6], 1 }
 0x1af   :  { %249 = vsyncpa [#allocation4], 1 }
 0x1b0   :  { %251 = vsyncpa [#allocation4 + $0x1], 1 }

</bundles_post_ra>
